<compile_context>
chip_gen: v6e
topology: v6e:2x2x1
jax: 0.10.0
libtpu: 0.0.40
codegen_flags: <defaults>
</compile_context>

<pallas_src>
import functools

import jax
import jax.numpy as jnp
import numpy as np
from jax.experimental import pallas as pl
from jax.experimental.pallas import tpu as pltpu

_TM_CAP = 8192  # longest M run worth issuing per grid step


def _round_up(x, m):
    return ((x + m - 1) // m) * m


def _vmem_physical_bytes():
    """Per-core VMEM capacity; conservative fallback if the query fails."""
    try:
        return int(pltpu.get_tpu_info().vmem_capacity_bytes)
    except Exception:  # noqa: BLE001 - trace-time query; fall back safely
        return 64 << 20  # v7x per-TensorCore VMEM (smallest of the family)


def _tile_footprint(F_in, F_pad, x_bytes, out_bytes):
    """(per-row bytes, fixed bytes) of VMEM used by one pipelined grid step."""
    lane_in = max(_round_up(F_in, 128), 128)  # x last dim is lane-padded in VMEM
    per_row = (2 * lane_in * x_bytes          # x tile, double-buffered
               + 2 * F_pad * out_bytes        # out tile, double-buffered
               + F_pad * 4)                   # f32 z matmul temporary
    if x_bytes < 4:
        per_row += lane_in * 4                # in-kernel f32 upcast of x
    fixed = 4 * (_round_up(F_in, 8) * F_pad   # W (f32), ideally single-buffered
                 + 8 * F_pad)                 # b (f32), one sublane-padded row
    return per_row, fixed


def _choose_tm(N, per_row, fixed, budget_bytes, sub):
    """Largest row tile that keeps the pipeline inside `budget_bytes`."""
    avail = max(budget_bytes - fixed, sub * per_row)
    tm = (int(avail // per_row) // sub) * sub
    tm = min(tm, _TM_CAP)
    if tm >= N:
        # Single block covering all rows (full-dim blocks are always legal).
        return N if N % 8 == 0 else _round_up(N, 8)
    return max(tm, sub)


def _sine_layer_kernel(x_ref, w_ref, b_ref, o_ref):
    # MXU matmul (f32 accumulate), VPU bias add, VPU range-reduction+poly sin.
    # omega_0 is already folded into w_ref / b_ref.
    # NOTE: for very wide layers the binding unit may be the sin polynomial
    # (VALU), not HBM -- check bundles before chasing more bandwidth.
    x = x_ref[...].astype(jnp.float32)  # no-op for f32 inputs
    z = jnp.dot(x, w_ref[...], preferred_element_type=jnp.float32)
    o_ref[...] = jnp.sin(z + b_ref[...]).astype(o_ref.dtype)


@functools.partial(
    jax.jit,
    static_argnames=("tm_override", "io_dtype", "single_buffer_weights"))
def _forward_impl(x, w_scaled, b_scaled, *, tm_override, io_dtype,
                  single_buffer_weights):
    N, F_in = x.shape
    F_out = w_scaled.shape[1]

    # Lane-dense output: pad F_out up to a multiple of 128 (zero cols are
    # harmless; they are sliced away below).
    F_pad = _round_up(F_out, 128)
    if F_pad != F_out:
        w_scaled = jnp.pad(w_scaled, ((0, 0), (0, F_pad - F_out)))
        b_scaled = jnp.pad(b_scaled, ((0, 0), (0, F_pad - F_out)))

    io_dtype = jnp.dtype(io_dtype)
    x = x.astype(io_dtype)
    x_bytes = io_dtype.itemsize
    out_bytes = io_dtype.itemsize

    # ---- VMEM-budget-driven row tile -------------------------------------
    per_row, fixed = _tile_footprint(F_in, F_pad, x_bytes, out_bytes)
    if not single_buffer_weights:
        fixed *= 2  # W/b end up double-buffered in the fallback path
    phys = _vmem_physical_bytes()
    budget = int(phys * 0.6)  # headroom for compiler scratch / semaphores
    sub = 8 if min(x_bytes, out_bytes) >= 4 else 16  # sublane packing of I/O
    TM = _choose_tm(N, per_row, fixed, budget, sub)
    if tm_override is not None:
        assert tm_override % 8 == 0
        TM = min(int(tm_override), _round_up(N, 8))

    footprint = fixed + per_row * TM
    vmem_limit = max(32 << 20, footprint + (8 << 20))
    vmem_limit = min(vmem_limit, int(phys * 0.9))
    vmem_limit = max(vmem_limit, footprint + (1 << 20))

    grid = (pl.cdiv(N, TM),)

    # Grid-invariant W / b: single-buffer them when the API allows it.
    resident_kwargs = (
        dict(pipeline_mode=pl.Buffered(1)) if single_buffer_weights else {})
    w_spec = pl.BlockSpec((F_in, F_pad), lambda i: (0, 0), **resident_kwargs)
    b_spec = pl.BlockSpec((1, F_pad), lambda i: (0, 0), **resident_kwargs)

    cost = pl.CostEstimate(
        flops=2 * N * F_in * F_pad,
        transcendentals=N * F_pad,
        bytes_accessed=(N * F_in * x_bytes + F_in * F_pad * 4
                        + F_pad * 4 + N * F_pad * out_bytes),
    )

    out = pl.pallas_call(
        _sine_layer_kernel,
        out_shape=jax.ShapeDtypeStruct((N, F_pad), io_dtype),
        grid=grid,
        in_specs=[
            pl.BlockSpec((TM, F_in), lambda i: (i, 0)),  # row tile of x
            w_spec,                                      # W resident
            b_spec,                                      # b resident
        ],
        out_specs=pl.BlockSpec((TM, F_pad), lambda i: (i, 0)),
        compiler_params=pltpu.CompilerParams(
            # Rows are independent -> megacore sharding on multi-TC chips,
            # neutral elsewhere.  (CORE_PARALLEL is the explicit v7x option.)
            dimension_semantics=("parallel",),
            vmem_limit_bytes=int(vmem_limit),
        ),
        cost_estimate=cost,
    )(x, w_scaled, b_scaled)

    if F_pad != F_out:
        out = out[:, :F_out]
    return out


def sine_layer_forward(x, w_scaled, b_scaled, *, tm=None, io_dtype=jnp.float32):
    """sin(x @ w_scaled + b_scaled) with omega_0 pre-folded into w/b.

    x:        (N, F_in)     float32 (cast to io_dtype for HBM traffic)
    w_scaled: (F_in, F_out) float32
    b_scaled: (1, F_out)    float32
    """
    try:
        return _forward_impl(x, w_scaled, b_scaled, tm_override=tm,
                             io_dtype=io_dtype, single_buffer_weights=True)
    except Exception:  # noqa: BLE001 - pl.Buffered(1) unsupported -> fallback
        return _forward_impl(x, w_scaled, b_scaled, tm_override=tm,
                             io_dtype=io_dtype, single_buffer_weights=False)


def init_sine_layer_params(key, in_features, out_features, is_first=False,
                           omega_0=30.0):
    """Raw params matching SineLayer.init_weights + nn.Linear default bias."""
    kw, kb = jax.random.split(key)
    if is_first:
        bound_w = 1.0 / in_features
    else:
        bound_w = np.sqrt(6.0 / in_features) / omega_0
    # PyTorch Linear weight is (out, in); we store transposed (in, out).
    w_t = jax.random.uniform(kw, (in_features, out_features),
                             minval=-bound_w, maxval=bound_w,
                             dtype=jnp.float32)
    bound_b = 1.0 / np.sqrt(in_features)
    b = jax.random.uniform(kb, (1, out_features),
                           minval=-bound_b, maxval=bound_b,
                           dtype=jnp.float32)
    return w_t, b


def fold_omega(w_t, b, omega_0):
    """One-time constant fold: sin(w0*(xW+b)) == sin(x(w0*W) + w0*b)."""
    return w_t * omega_0, b * omega_0


if __name__ == "__main__":
    key = jax.random.PRNGKey(0)
    k_x1, k_p1, k_x2, k_p2 = jax.random.split(key, 4)
    omega_0 = 30.0

    # Case 1: first layer (SIREN coords), F_out < 128 exercises lane padding,
    # budget-driven TM picks a single full block.
    N1, Fi1, Fo1 = 8, 2, 32
    x1 = jax.random.uniform(k_x1, (N1, Fi1), minval=-1.0, maxval=1.0,
                            dtype=jnp.float32)
    w1, b1 = init_sine_layer_params(k_p1, Fi1, Fo1, is_first=True,
                                    omega_0=omega_0)
    ws1, bs1 = fold_omega(w1, b1, omega_0)
    out1 = jax.block_until_ready(sine_layer_forward(x1, ws1, bs1))
    ref1 = jnp.sin(omega_0 * (x1 @ w1 + b1))
    np.testing.assert_allclose(np.asarray(out1), np.asarray(ref1),
                               rtol=1e-5, atol=1e-5)

    # Case 2: hidden layer, explicit small tm -> multi-block grid with a
    # ragged last row tile; F_out a multiple of 128 (no padding).
    N2, Fi2, Fo2 = 200, 32, 128
    x2 = jax.random.uniform(k_x2, (N2, Fi2), minval=-1.0, maxval=1.0,
                            dtype=jnp.float32)
    w2, b2 = init_sine_layer_params(k_p2, Fi2, Fo2, is_first=False,
                                    omega_0=omega_0)
    ws2, bs2 = fold_omega(w2, b2, omega_0)
    out2 = jax.block_until_ready(sine_layer_forward(x2, ws2, bs2, tm=64))
    ref2 = jnp.sin(omega_0 * (x2 @ w2 + b2))
    np.testing.assert_allclose(np.asarray(out2), np.asarray(ref2),
                               rtol=1e-5, atol=1e-5)

    # Case 3: bf16 I/O variant (halves HBM bytes on the memory-bound path);
    # W/b and the accumulate stay f32, so only x/out rounding enters -> loose
    # tolerance.
    out3 = jax.block_until_ready(
        sine_layer_forward(x2, ws2, bs2, io_dtype=jnp.bfloat16))
    np.testing.assert_allclose(np.asarray(out3.astype(jnp.float32)),
                               np.asarray(ref2), rtol=0.0, atol=1e-1)

    print("KERNEL_OK")
</pallas_src>

<mosaic_0001>
module attributes {stable_mosaic.version = 11 : i64} {
  func.func @_sine_layer_kernel(%arg0: i32, %arg1: memref<8x2xf32, #tpu.memory_space<vmem>>, %arg2: memref<2x128xf32, #tpu.memory_space<vmem>>, %arg3: memref<1x128xf32, #tpu.memory_space<vmem>>, %arg4: memref<8x128xf32, #tpu.memory_space<vmem>>) attributes {dimension_semantics = [#tpu.dimension_semantics<parallel>], iteration_bounds = array<i64: 1>, scalar_prefetch = 0 : i64, scratch_operands = 0 : i64, tpu.core_type = #tpu.core_type<tc>, window_params = [{transform_indices = @transform_0, window_bounds = array<i64: 8, 2>}, {pipeline_mode = #tpu.pipeline_mode<synchronous>, transform_indices = @transform_1, window_bounds = array<i64: 2, 128>}, {pipeline_mode = #tpu.pipeline_mode<synchronous>, transform_indices = @transform_2, window_bounds = array<i64: 1, 128>}, {transform_indices = @transform_3, window_bounds = array<i64: 8, 128>}]} {
    %c0 = arith.constant 0 : index
    %c0_0 = arith.constant 0 : index
    %0 = vector.load %arg1[%c0, %c0_0] : memref<8x2xf32, #tpu.memory_space<vmem>>, vector<8x2xf32>
    %c0_1 = arith.constant 0 : index
    %c0_2 = arith.constant 0 : index
    %1 = vector.load %arg2[%c0_1, %c0_2] : memref<2x128xf32, #tpu.memory_space<vmem>>, vector<2x128xf32>
    %cst = arith.constant dense<0.000000e+00> : vector<8x128xf32>
    %2 = tpu.matmul %0, %1, %cst {dimension_numbers = #tpu.dot_dimension_numbers<[1], [0], [0], [1], [0, 0, 1, 1], [], []>} : vector<8x2xf32>, vector<2x128xf32>, vector<8x128xf32> -> vector<8x128xf32>
    %c0_3 = arith.constant 0 : index
    %c0_4 = arith.constant 0 : index
    %3 = vector.load %arg3[%c0_3, %c0_4] : memref<1x128xf32, #tpu.memory_space<vmem>>, vector<1x128xf32>
    %4 = vector.broadcast %3 : vector<1x128xf32> to vector<8x128xf32>
    %5 = arith.addf %2, %4 : vector<8x128xf32>
    %6 = math.sin %5 : vector<8x128xf32>
    %c0_5 = arith.constant 0 : index
    %c0_6 = arith.constant 0 : index
    %7 = vector.load %arg4[%c0_5, %c0_6] : memref<8x128xf32, #tpu.memory_space<vmem>>, vector<8x128xf32>
    tpu.vector_store %arg4[%c0_5, %c0_6], %6 {strides = array<i32>} : memref<8x128xf32, #tpu.memory_space<vmem>>, vector<8x128xf32>,
    return
  }
  func.func @transform_0(%arg0: i32) -> (i32, i32) {
    %c0_i32 = arith.constant 0 : i32
    %c0_i32_0 = arith.constant 0 : i32
    return %arg0, %c0_i32 : i32, i32
  }
  func.func @transform_1(%arg0: i32) -> (i32, i32) {
    %c0_i32 = arith.constant 0 : i32
    %c0_i32_0 = arith.constant 0 : i32
    %c0_i32_1 = arith.constant 0 : i32
    return %c0_i32, %c0_i32_0 : i32, i32
  }
  func.func @transform_2(%arg0: i32) -> (i32, i32) {
    %c0_i32 = arith.constant 0 : i32
    %c0_i32_0 = arith.constant 0 : i32
    %c0_i32_1 = arith.constant 0 : i32
    return %c0_i32, %c0_i32_0 : i32, i32
  }
  func.func @transform_3(%arg0: i32) -> (i32, i32) {
    %c0_i32 = arith.constant 0 : i32
    %c0_i32_0 = arith.constant 0 : i32
    return %arg0, %c0_i32 : i32, i32
  }
}

module attributes {stable_mosaic.version = 11 : i64} {
  func.func @_sine_layer_kernel(%arg0: i32, %arg1: memref<8x2xf32, #tpu.memory_space<vmem>>, %arg2: memref<2x128xf32, #tpu.memory_space<vmem>>, %arg3: memref<1x128xf32, #tpu.memory_space<vmem>>, %arg4: memref<8x128xf32, #tpu.memory_space<vmem>>) attributes {dimension_semantics = [#tpu.dimension_semantics<parallel>], iteration_bounds = array<i64: 1>, scalar_prefetch = 0 : i64, scratch_operands = 0 : i64, tpu.core_type = #tpu.core_type<tc>, window_params = [{transform_indices = @transform_0, window_bounds = array<i64: 8, 2>}, {pipeline_mode = #tpu.pipeline_mode<synchronous>, transform_indices = @transform_1, window_bounds = array<i64: 2, 128>}, {pipeline_mode = #tpu.pipeline_mode<synchronous>, transform_indices = @transform_2, window_bounds = array<i64: 1, 128>}, {transform_indices = @transform_3, window_bounds = array<i64: 8, 128>}]} {
    %c0 = arith.constant 0 : index
    %c0_0 = arith.constant 0 : index
    %0 = vector.load %arg1[%c0, %c0_0] : memref<8x2xf32, #tpu.memory_space<vmem>>, vector<8x2xf32>
    %c0_1 = arith.constant 0 : index
    %c0_2 = arith.constant 0 : index
    %1 = vector.load %arg2[%c0_1, %c0_2] : memref<2x128xf32, #tpu.memory_space<vmem>>, vector<2x128xf32>
    %cst = arith.constant dense<0.000000e+00> : vector<8x128xf32>
    %2 = tpu.matmul %0, %1, %cst {dimension_numbers = #tpu.dot_dimension_numbers<[1], [0], [0], [1], [0, 0, 1, 1], [], []>} : vector<8x2xf32>, vector<2x128xf32>, vector<8x128xf32> -> vector<8x128xf32>
    %c0_3 = arith.constant 0 : index
    %c0_4 = arith.constant 0 : index
    %3 = vector.load %arg3[%c0_3, %c0_4] : memref<1x128xf32, #tpu.memory_space<vmem>>, vector<1x128xf32>
    %4 = vector.broadcast %3 : vector<1x128xf32> to vector<8x128xf32>
    %5 = arith.addf %2, %4 : vector<8x128xf32>
    %6 = math.sin %5 : vector<8x128xf32>
    %c0_5 = arith.constant 0 : index
    %c0_6 = arith.constant 0 : index
    %7 = vector.load %arg4[%c0_5, %c0_6] : memref<8x128xf32, #tpu.memory_space<vmem>>, vector<8x128xf32>
    tpu.vector_store %arg4[%c0_5, %c0_6], %6 {strides = array<i32>} : memref<8x128xf32, #tpu.memory_space<vmem>>, vector<8x128xf32>,
    return
  }
  func.func @transform_0(%arg0: i32) -> (i32, i32) {
    %c0_i32 = arith.constant 0 : i32
    %c0_i32_0 = arith.constant 0 : i32
    return %arg0, %c0_i32 : i32, i32
  }
  func.func @transform_1(%arg0: i32) -> (i32, i32) {
    %c0_i32 = arith.constant 0 : i32
    %c0_i32_0 = arith.constant 0 : i32
    %c0_i32_1 = arith.constant 0 : i32
    return %c0_i32, %c0_i32_0 : i32, i32
  }
  func.func @transform_2(%arg0: i32) -> (i32, i32) {
    %c0_i32 = arith.constant 0 : i32
    %c0_i32_0 = arith.constant 0 : i32
    %c0_i32_1 = arith.constant 0 : i32
    return %c0_i32, %c0_i32_0 : i32, i32
  }
  func.func @transform_3(%arg0: i32) -> (i32, i32) {
    %c0_i32 = arith.constant 0 : i32
    %c0_i32_0 = arith.constant 0 : i32
    return %arg0, %c0_i32 : i32, i32
  }
}

</mosaic_0001>

<bundles_post_ra>
// kernel: _forward_impl.1
= control target key start
LH: loop header
LB: loop body
LE: loop exit
PB: predicated region body
PF: predicated region fallthrough
CT: control target
= control target key end

     0   :  { %vm28_vm0 = vcmask 1041408   ;;  %v274_v2 = vmov 0.0   ;;  %vm275_vm1 = vmmov 0   ;;  %vm24_vm2 = vcmask 15360   ;;  %s336_s0 = inlined_call_operand.vmem [shape: f32[8,2], index: 0, kind: input, shape index: {}]   ;;  %s337_s1 = inlined_call_operand.vmem [shape: f32[2,128], index: 1, kind: input, shape index: {}]   ;;  %s338_s2 = inlined_call_operand.vmem [shape: f32[1,128], index: 2, kind: input, shape index: {}]   ;;  %s339_s3 = inlined_call_operand.hbm [shape: f32[8,128], index: 3, kind: output, shape index: {}]  }
   0x1   :  { %v16_v0 = vld [vmem:[%s337_s1] sm:$0x3]  ;;  %230 = vmatprep.subr.mxu0 %v274_v2  ;;  %232 = vmatprep.mubr.msk.f32.mxu0 %vm275_vm1, %v274_v2 }
   0x2   :  { %v15_v1 = vld [vmem:[%s336_s0] sm:$0xff] }
   0x3   :  { %8 = vsyncpa [#allocation3], 0  ;;  %231 = vmatpush3.msk.msra.mxu0 %vm28_vm0, %v16_v0  ;;  %v221_v3 = vld [vmem:[%s338_s2] ss:$0 sm:$0xff]  ;;  %v276_v17 = vmov 683565275  }
   0x4   :  { %233 = vmatmul.mubr.msk.f32.vlgmr.msra.gmra.mxu0 %vm24_vm2, %v15_v1  ;;  %v277_v19 = vmov 2475754826   ;;  %v278_v22 = vmov 2131351028   ;;  %v279_v25 = vmov 2102212464  }
   0x5   :  { %v280_v28 = vmov 920167782   ;;  %v281_v31 = vmov 1326507024   ;;  %s282_s0 = smov [#allocation2]  }
   0x6   :  { %s213_s1 = sshll.u32 %s282_s0, 4  ;;  %s214_s1 = int_to_ptr.vmem [resolvable:$true] %s213_s1 }
   0x7   :  { %s252_s2 = scalar_lea.vmem %s214_s1, 128  ;;  %p257_p1 = scmp.lt.s32.totalorder %s214_s1, %s214_s1 }
   0x8   :  { %p253_p0 = scmp.ne.s32.totalorder %s214_s1, %s252_s2  ;;  %p258_p2 = scmp.lt.s32.totalorder %s252_s2, %s252_s2 }
   0xa   :  { %p259_p3 = por %p258_p2, %p257_p1 }
   0xc   :  { %p260_p4 = pnand %p259_p3, %p253_p0 }
  0xc4   :  { %v98_v4 = vpop.f32.mrf.mxu0 }
  0xc5   :  { %v312_v5 = vadd.f32 %v221_v3, %v98_v4 }
  0xc6   :  { %v234_v6 = vpop.f32.mrf.mxu0 }
  0xc7   :  { %v105_v7 = vand.u32 2139095040, %v312_v5  ;;  %v102_v11 = vand.u32 2147483647, %v312_v5  ;;  %vm104_vm10 = vcmp.lt.s32.totalorder %v312_v5, 0  ;;  %vm194_vm15 = vweird.f32 %v312_v5 }
  0xc9   :  { %v106_v8 = vshrl.u32 %v105_v7, 23  ;;  %v109_v14 = vand.u32 8388607, %v102_v11  ;;  %vm103_vm11 = vcmp.le.f32.partialorder %v102_v11, 0.7853982 }
  0xcb   :  { %v224_v9 = vadd.s32 4294967169, %v106_v8  ;;  %v110_v33 = vor.u32 8388608, %v109_v14 }
  0xcd   :  { %v112_v10 = vadd.s32 1, %v224_v9  ;;  %v150_v47 = vshll.u32 %v110_v33, 8 }
  0xcf   :  { %vm113_vm3 = vcmp.gt.s32.totalorder %v112_v10, 0 }
  0xd0   :  { %v114_v12 = vsel %vm113_vm3, %v112_v10, 0 }
  0xd1   :  { %v116_v13 = vand.u32 31, %v114_v12  ;;  %v115_v16 = vshrl.u32 %v114_v12, 5 }
  0xd3   :  { %v117_v15 = vsub.s32 32, %v116_v13  ;;  %v119_v18 = vshll.u32 %v276_v17, %v116_v13  ;;  %v122_v20 = vshll.u32 %v277_v19, %v116_v13  ;;  %v125_v24 = vshll.u32 %v278_v22, %v116_v13 }
  0xd4   :  { %v128_v27 = vshll.u32 %v279_v25, %v116_v13  ;;  %v131_v30 = vshll.u32 %v280_v28, %v116_v13  ;;  %vm134_vm4 = vcmp.lt.s32.totalorder %v115_v16, 1  ;;  %vm137_vm5 = vcmp.lt.s32.totalorder %v115_v16, 4 }
  0xd5   :  { %v120_v21 = vshrl.u32 %v277_v19, %v117_v15  ;;  %v123_v23 = vshrl.u32 %v278_v22, %v117_v15  ;;  %v126_v26 = vshrl.u32 %v279_v25, %v117_v15  ;;  %v129_v29 = vshrl.u32 %v280_v28, %v117_v15 }
  0xd6   :  { %v132_v32 = vshrl.u32 %v281_v31, %v117_v15  ;;  %v118_v42 = vshrl.u32 %v276_v17, %v117_v15  ;;  %vm136_vm6 = vcmp.lt.s32.totalorder %v115_v16, 3  ;;  %vm135_vm7 = vcmp.lt.s32.totalorder %v115_v16, 2 }
  0xd7   :  { %v121_v34 = vor.u32 %v120_v21, %v119_v18  ;;  %v124_v35 = vor.u32 %v123_v23, %v122_v20  ;;  %v127_v36 = vor.u32 %v126_v26, %v125_v24  ;;  %v130_v37 = vor.u32 %v129_v29, %v128_v27 }
  0xd8   :  { %v133_v38 = vor.u32 %v132_v32, %v131_v30 }
  0xd9   :  { %v139_v39 = vsel %vm137_vm5, %v127_v36, 2102212464  ;;  %v142_v40 = vsel %vm134_vm4, %v121_v34, %v124_v35  ;;  %v146_v41 = vsel %vm134_vm4, %v124_v35, %v127_v36  ;;  %v143_v43 = vsel %vm137_vm5, %v130_v37, 920167782 }
  0xda   :  { %v147_v44 = vsel %vm137_vm5, %v133_v38, 1326507024  ;;  %v144_v45 = vsel %vm136_vm6, %v127_v36, %v143_v43  ;;  %v138_v48 = vsel %vm134_vm4, %v118_v42, %v121_v34  ;;  %v140_v49 = vsel %vm136_vm6, %v124_v35, %v139_v39 }
  0xdb   :  { %v148_v46 = vsel %vm136_vm6, %v130_v37, %v147_v44  ;;  %v145_v50 = vsel %vm135_vm7, %v142_v40, %v144_v45  ;;  %v141_v56 = vsel %vm135_vm7, %v138_v48, %v140_v49 }
  0xdc   :  { %v149_v51 = vsel %vm135_vm7, %v146_v41, %v148_v46  ;;  %v321_v54 = vmul.u32.u64.low %v150_v47, %v145_v50  ;;  %v322_v55 = vmul.u32.u64.high %v150_v47, %v145_v50, %v321_v54  ;;  %v157_v58 = vmul.u32 %v150_v47, %v141_v56 }
  0xdd   :  { %v318_v52 = vmul.u32.u64.low %v150_v47, %v149_v51  ;;  %v319_v53 = vmul.u32.u64.high %v150_v47, %v149_v51, %v318_v52 }
  0xde   :  { %v160_v57 = vadd.s32 1, %v322_v55 }
  0xdf   :  { %vm159_vm8 = vc.u32 %v319_v53, %v321_v54  ;;  %v158_v7 = vadd.s32 %v321_v54, %v319_v53 }
  0xe0   :  { %v161_v59 = vsel %vm159_vm8, %v160_v57, %v322_v55 }
  0xe1   :  { %v162_v60 = vadd.s32 %v161_v59, %v157_v58 }
  0xe3   :  { %v163_v61 = vadd.s32 536870912, %v162_v60 }
  0xe5   :  { %v164_v62 = vshrl.u32 %v163_v61, 30 }
  0xe7   :  { %v165_v63 = vshll.u32 %v164_v62, 30  ;;  %v188_v21 = vsub.s32 4, %v164_v62 }
  0xe9   :  { %v166_v0 = vsub.s32 %v162_v60, %v165_v63  ;;  %v189_v24 = vsel %vm104_vm10, %v188_v21, %v164_v62 }
  0xea   :  { %v191_v25 = vsel %vm103_vm11, 0, %v189_v24 }
  0xeb   :  { %v168_v1 = vsub.s32 0, %v166_v0  ;;  %v195_v26 = vadd.s32 3, %v191_v25 }
  0xed   :  { %v225_v2 = vmin.u32 %v168_v1, %v166_v0  ;;  %v196_v27 = vand.u32 3, %v195_v26 }
  0xef   :  { %v170_v3 = vclz %v225_v2  ;;  %vm201_vm12 = vcmp.eq.s32.totalorder %v196_v27, 2  ;;  %vm198_vm13 = vcmp.eq.s32.totalorder %v196_v27, 0  ;;  %vm197_vm14 = vcmp.lt.s32.totalorder %v196_v27, 2 }
  0xf1   :  { %v226_v4 = vadd.s32 4294967294, %v170_v3 }
  0xf3   :  { %vm227_vm9 = vcmp.lt.s32.totalorder %v226_v4, 0 }
  0xf4   :  { %v173_v6 = vsel %vm227_vm9, 0, %v226_v4 }
  0xf5   :  { %v174_v8 = vsub.s32 32, %v173_v6  ;;  %v178_v9 = vsub.s32 4294967266, %v173_v6  ;;  %v175_v10 = vshll.u32 %v166_v0, %v173_v6 }
  0xf7   :  { %v176_v12 = vshrl.u32 %v158_v7, %v174_v8  ;;  %v179_v13 = vadd.s32 127, %v178_v9 }
  0xf9   :  { %v177_v14 = vor.u32 %v176_v12, %v175_v10  ;;  %v180_v15 = vshll.u32 %v179_v13, 23 }
  0xfb   :  { %v181_v16 = vor.u32 4788187, %v180_v15  ;;  %v184_v18 = vcvt.s32.f32 %v177_v14 }
  0xfd   :  { %v182_v17 = vand.u32 2147483647, %v181_v16 }
  0xff   :  { %v185_v19 = vmul.f32 %v184_v18, %v182_v17 }
 0x101   :  { %v186_v20 = vxor.u32 2147483648, %v185_v19 }
 0x103   :  { %v187_v22 = vsel %vm104_vm10, %v186_v20, %v185_v19 }
 0x104   :  { %v190_v23 = vsel %vm103_vm11, %v312_v5, %v187_v22 }
 0x105   :  { %248 = vcosq.f32 %v190_v23 }
 0x106   :  { %250 = vsinq.f32 %v190_v23 }
 0x112   :  { %v249_v28 = vpop.eup %248 }
 0x113   :  { %v251_v29 = vpop.eup %250  ;;  %v202_v30 = vxor.u32 2147483648, %v249_v28 }
 0x114   :  { %v199_v31 = vxor.u32 2147483648, %v251_v29 }
 0x115   :  { %v203_v32 = vsel %vm201_vm12, %v202_v30, %v251_v29 }
 0x116   :  { %v200_v33 = vsel %vm198_vm13, %v249_v28, %v199_v31 }
 0x117   :  { %v204_v11 = vsel %vm197_vm14, %v200_v33, %v203_v32 }
 0x118   :  { %v205_v34 = vsel %vm194_vm15, nan, %v204_v11 }
 0x119   :  { %206 = vst [vmem:[#allocation2] sm:$0xff] %v205_v34 }
 0x11a   :  { %263 = shalt.err (!%p260_p4)
}
 0x11b   :  { %216 = dma.vmem_to_hbm [thread:$0]  %s214_s1, 128, %s339_s3, [#allocation3]  }
 0x11c   :  { %272 = dma.done.wait [#allocation3], 128  }
 0x11d   :  { %273 = vsyncadd [#allocation3], 4294967168 }
 0x11e   :  { %220 = vsyncpa [#allocation3], 1 }

// kernel: _forward_impl.1
= control target key start
LH: loop header
LB: loop body
LE: loop exit
PB: predicated region body
PF: predicated region fallthrough
CT: control target
= control target key end

     0   :  { %vm28_vm0 = vcmask 1041408   ;;  %v274_v2 = vmov 0.0   ;;  %vm275_vm1 = vmmov 0   ;;  %vm24_vm2 = vcmask 15360   ;;  %s336_s0 = inlined_call_operand.vmem [shape: f32[8,2], index: 0, kind: input, shape index: {}]   ;;  %s337_s1 = inlined_call_operand.vmem [shape: f32[2,128], index: 1, kind: input, shape index: {}]   ;;  %s338_s2 = inlined_call_operand.vmem [shape: f32[1,128], index: 2, kind: input, shape index: {}]   ;;  %s339_s3 = inlined_call_operand.hbm [shape: f32[8,128], index: 3, kind: output, shape index: {}]  }
   0x1   :  { %v16_v0 = vld [vmem:[%s337_s1] sm:$0x3]  ;;  %230 = vmatprep.subr.mxu0 %v274_v2  ;;  %232 = vmatprep.mubr.msk.f32.mxu0 %vm275_vm1, %v274_v2 }
   0x2   :  { %v15_v1 = vld [vmem:[%s336_s0] sm:$0xff] }
   0x3   :  { %8 = vsyncpa [#allocation3], 0  ;;  %231 = vmatpush3.msk.msra.mxu0 %vm28_vm0, %v16_v0  ;;  %v221_v3 = vld [vmem:[%s338_s2] ss:$0 sm:$0xff]  ;;  %v276_v17 = vmov 683565275  }
   0x4   :  { %233 = vmatmul.mubr.msk.f32.vlgmr.msra.gmra.mxu0 %vm24_vm2, %v15_v1  ;;  %v277_v19 = vmov 2475754826   ;;  %v278_v22 = vmov 2131351028   ;;  %v279_v25 = vmov 2102212464  }
   0x5   :  { %v280_v28 = vmov 920167782   ;;  %v281_v31 = vmov 1326507024   ;;  %s282_s0 = smov [#allocation2]  }
   0x6   :  { %s213_s1 = sshll.u32 %s282_s0, 4  ;;  %s214_s1 = int_to_ptr.vmem [resolvable:$true] %s213_s1 }
   0x7   :  { %s252_s2 = scalar_lea.vmem %s214_s1, 128  ;;  %p257_p1 = scmp.lt.s32.totalorder %s214_s1, %s214_s1 }
   0x8   :  { %p253_p0 = scmp.ne.s32.totalorder %s214_s1, %s252_s2  ;;  %p258_p2 = scmp.lt.s32.totalorder %s252_s2, %s252_s2 }
   0xa   :  { %p259_p3 = por %p258_p2, %p257_p1 }
   0xc   :  { %p260_p4 = pnand %p259_p3, %p253_p0 }
  0xc4   :  { %v98_v4 = vpop.f32.mrf.mxu0 }
  0xc5   :  { %v312_v5 = vadd.f32 %v221_v3, %v98_v4 }
  0xc6   :  { %v234_v6 = vpop.f32.mrf.mxu0 }
  0xc7   :  { %v105_v7 = vand.u32 2139095040, %v312_v5  ;;  %v102_v11 = vand.u32 2147483647, %v312_v5  ;;  %vm104_vm10 = vcmp.lt.s32.totalorder %v312_v5, 0  ;;  %vm194_vm15 = vweird.f32 %v312_v5 }
  0xc9   :  { %v106_v8 = vshrl.u32 %v105_v7, 23  ;;  %v109_v14 = vand.u32 8388607, %v102_v11  ;;  %vm103_vm11 = vcmp.le.f32.partialorder %v102_v11, 0.7853982 }
  0xcb   :  { %v224_v9 = vadd.s32 4294967169, %v106_v8  ;;  %v110_v33 = vor.u32 8388608, %v109_v14 }
  0xcd   :  { %v112_v10 = vadd.s32 1, %v224_v9  ;;  %v150_v47 = vshll.u32 %v110_v33, 8 }
  0xcf   :  { %vm113_vm3 = vcmp.gt.s32.totalorder %v112_v10, 0 }
  0xd0   :  { %v114_v12 = vsel %vm113_vm3, %v112_v10, 0 }
  0xd1   :  { %v116_v13 = vand.u32 31, %v114_v12  ;;  %v115_v16 = vshrl.u32 %v114_v12, 5 }
  0xd3   :  { %v117_v15 = vsub.s32 32, %v116_v13  ;;  %v119_v18 = vshll.u32 %v276_v17, %v116_v13  ;;  %v122_v20 = vshll.u32 %v277_v19, %v116_v13  ;;  %v125_v24 = vshll.u32 %v278_v22, %v116_v13 }
  0xd4   :  { %v128_v27 = vshll.u32 %v279_v25, %v116_v13  ;;  %v131_v30 = vshll.u32 %v280_v28, %v116_v13  ;;  %vm134_vm4 = vcmp.lt.s32.totalorder %v115_v16, 1  ;;  %vm137_vm5 = vcmp.lt.s32.totalorder %v115_v16, 4 }
  0xd5   :  { %v120_v21 = vshrl.u32 %v277_v19, %v117_v15  ;;  %v123_v23 = vshrl.u32 %v278_v22, %v117_v15  ;;  %v126_v26 = vshrl.u32 %v279_v25, %v117_v15  ;;  %v129_v29 = vshrl.u32 %v280_v28, %v117_v15 }
  0xd6   :  { %v132_v32 = vshrl.u32 %v281_v31, %v117_v15  ;;  %v118_v42 = vshrl.u32 %v276_v17, %v117_v15  ;;  %vm136_vm6 = vcmp.lt.s32.totalorder %v115_v16, 3  ;;  %vm135_vm7 = vcmp.lt.s32.totalorder %v115_v16, 2 }
  0xd7   :  { %v121_v34 = vor.u32 %v120_v21, %v119_v18  ;;  %v124_v35 = vor.u32 %v123_v23, %v122_v20  ;;  %v127_v36 = vor.u32 %v126_v26, %v125_v24  ;;  %v130_v37 = vor.u32 %v129_v29, %v128_v27 }
  0xd8   :  { %v133_v38 = vor.u32 %v132_v32, %v131_v30 }
  0xd9   :  { %v139_v39 = vsel %vm137_vm5, %v127_v36, 2102212464  ;;  %v142_v40 = vsel %vm134_vm4, %v121_v34, %v124_v35  ;;  %v146_v41 = vsel %vm134_vm4, %v124_v35, %v127_v36  ;;  %v143_v43 = vsel %vm137_vm5, %v130_v37, 920167782 }
  0xda   :  { %v147_v44 = vsel %vm137_vm5, %v133_v38, 1326507024  ;;  %v144_v45 = vsel %vm136_vm6, %v127_v36, %v143_v43  ;;  %v138_v48 = vsel %vm134_vm4, %v118_v42, %v121_v34  ;;  %v140_v49 = vsel %vm136_vm6, %v124_v35, %v139_v39 }
  0xdb   :  { %v148_v46 = vsel %vm136_vm6, %v130_v37, %v147_v44  ;;  %v145_v50 = vsel %vm135_vm7, %v142_v40, %v144_v45  ;;  %v141_v56 = vsel %vm135_vm7, %v138_v48, %v140_v49 }
  0xdc   :  { %v149_v51 = vsel %vm135_vm7, %v146_v41, %v148_v46  ;;  %v321_v54 = vmul.u32.u64.low %v150_v47, %v145_v50  ;;  %v322_v55 = vmul.u32.u64.high %v150_v47, %v145_v50, %v321_v54  ;;  %v157_v58 = vmul.u32 %v150_v47, %v141_v56 }
  0xdd   :  { %v318_v52 = vmul.u32.u64.low %v150_v47, %v149_v51  ;;  %v319_v53 = vmul.u32.u64.high %v150_v47, %v149_v51, %v318_v52 }
  0xde   :  { %v160_v57 = vadd.s32 1, %v322_v55 }
  0xdf   :  { %vm159_vm8 = vc.u32 %v319_v53, %v321_v54  ;;  %v158_v7 = vadd.s32 %v321_v54, %v319_v53 }
  0xe0   :  { %v161_v59 = vsel %vm159_vm8, %v160_v57, %v322_v55 }
  0xe1   :  { %v162_v60 = vadd.s32 %v161_v59, %v157_v58 }
  0xe3   :  { %v163_v61 = vadd.s32 536870912, %v162_v60 }
  0xe5   :  { %v164_v62 = vshrl.u32 %v163_v61, 30 }
  0xe7   :  { %v165_v63 = vshll.u32 %v164_v62, 30  ;;  %v188_v21 = vsub.s32 4, %v164_v62 }
  0xe9   :  { %v166_v0 = vsub.s32 %v162_v60, %v165_v63  ;;  %v189_v24 = vsel %vm104_vm10, %v188_v21, %v164_v62 }
  0xea   :  { %v191_v25 = vsel %vm103_vm11, 0, %v189_v24 }
  0xeb   :  { %v168_v1 = vsub.s32 0, %v166_v0  ;;  %v195_v26 = vadd.s32 3, %v191_v25 }
  0xed   :  { %v225_v2 = vmin.u32 %v168_v1, %v166_v0  ;;  %v196_v27 = vand.u32 3, %v195_v26 }
  0xef   :  { %v170_v3 = vclz %v225_v2  ;;  %vm201_vm12 = vcmp.eq.s32.totalorder %v196_v27, 2  ;;  %vm198_vm13 = vcmp.eq.s32.totalorder %v196_v27, 0  ;;  %vm197_vm14 = vcmp.lt.s32.totalorder %v196_v27, 2 }
  0xf1   :  { %v226_v4 = vadd.s32 4294967294, %v170_v3 }
  0xf3   :  { %vm227_vm9 = vcmp.lt.s32.totalorder %v226_v4, 0 }
  0xf4   :  { %v173_v6 = vsel %vm227_vm9, 0, %v226_v4 }
  0xf5   :  { %v174_v8 = vsub.s32 32, %v173_v6  ;;  %v178_v9 = vsub.s32 4294967266, %v173_v6  ;;  %v175_v10 = vshll.u32 %v166_v0, %v173_v6 }
  0xf7   :  { %v176_v12 = vshrl.u32 %v158_v7, %v174_v8  ;;  %v179_v13 = vadd.s32 127, %v178_v9 }
  0xf9   :  { %v177_v14 = vor.u32 %v176_v12, %v175_v10  ;;  %v180_v15 = vshll.u32 %v179_v13, 23 }
  0xfb   :  { %v181_v16 = vor.u32 4788187, %v180_v15  ;;  %v184_v18 = vcvt.s32.f32 %v177_v14 }
  0xfd   :  { %v182_v17 = vand.u32 2147483647, %v181_v16 }
  0xff   :  { %v185_v19 = vmul.f32 %v184_v18, %v182_v17 }
 0x101   :  { %v186_v20 = vxor.u32 2147483648, %v185_v19 }
 0x103   :  { %v187_v22 = vsel %vm104_vm10, %v186_v20, %v185_v19 }
 0x104   :  { %v190_v23 = vsel %vm103_vm11, %v312_v5, %v187_v22 }
 0x105   :  { %248 = vcosq.f32 %v190_v23 }
 0x106   :  { %250 = vsinq.f32 %v190_v23 }
 0x112   :  { %v249_v28 = vpop.eup %248 }
 0x113   :  { %v251_v29 = vpop.eup %250  ;;  %v202_v30 = vxor.u32 2147483648, %v249_v28 }
 0x114   :  { %v199_v31 = vxor.u32 2147483648, %v251_v29 }
 0x115   :  { %v203_v32 = vsel %vm201_vm12, %v202_v30, %v251_v29 }
 0x116   :  { %v200_v33 = vsel %vm198_vm13, %v249_v28, %v199_v31 }
 0x117   :  { %v204_v11 = vsel %vm197_vm14, %v200_v33, %v203_v32 }
 0x118   :  { %v205_v34 = vsel %vm194_vm15, nan, %v204_v11 }
 0x119   :  { %206 = vst [vmem:[#allocation2] sm:$0xff] %v205_v34 }
 0x11a   :  { %263 = shalt.err (!%p260_p4)
}
 0x11b   :  { %216 = dma.vmem_to_hbm [thread:$0]  %s214_s1, 128, %s339_s3, [#allocation3]  }
 0x11c   :  { %272 = dma.done.wait [#allocation3], 128  }
 0x11d   :  { %273 = vsyncadd [#allocation3], 4294967168 }
 0x11e   :  { %220 = vsyncpa [#allocation3], 1 }

</bundles_post_ra>
